<compile_context>
chip_gen: v5e
topology: v5e:2x2
jax: 0.10.0
libtpu: 0.0.40
codegen_flags: <defaults>
</compile_context>

<pallas_src>
import math

import jax
import jax.numpy as jnp
from jax.experimental import pallas as pl
from jax.experimental.pallas import tpu as pltpu


def ann_kernel(x_ref, w1_ref, b1_ref, w2_ref, b2_ref, out_ref):
    # Batch-on-lanes hidden layer on the MXU: contract D of W1 (H, D) with D of
    # the x tile (TB, D)  ->  hT of shape (H, TB), f32 accumulation.
    hT = jax.lax.dot_general(
        w1_ref[...], x_ref[...],
        dimension_numbers=(((1,), (1,)), ((), ())),
        preferred_element_type=jnp.float32,
    )                                                   # (H, TB)
    hT = jnp.maximum(hT + b1_ref[...], 0.0)             # (H,1) bias bcast + ReLU (VPU)
    # Output neuron on the MXU: (1, H) @ (H, TB) -> (1, TB), lane-dense result.
    o = jax.lax.dot_general(
        w2_ref[...], hT,
        dimension_numbers=(((1,), (0,)), ((), ())),
        preferred_element_type=jnp.float32,
    )                                                   # (1, TB)
    o = o + b2_ref[0, 0]                                # scalar bias from SMEM
    out_ref[...] = jax.nn.sigmoid(o).astype(out_ref.dtype)


def _round_up(a, m):
    return -(-a // m) * m


def ann_forward(x, w1, b1, w2, b2, *, block_b=2048, use_bf16_inputs=False):
    """x: (B, D); w1: (H, D); b1: (H,); w2: (1, H); b2: (1,)  (PyTorch layout).

    use_bf16_inputs: store/stream x and W1 in bfloat16 (v6e/v7x memory-bound
    recommendation); accumulation and epilogue stay in float32.
    """
    x = jnp.asarray(x)
    B, D = x.shape
    H = w1.shape[0]

    in_dt = jnp.bfloat16 if use_bf16_inputs else jnp.float32
    x = x.astype(in_dt)
    w1 = jnp.asarray(w1).astype(in_dt)                      # (H, D), native layout
    b1_col = jnp.asarray(b1, jnp.float32).reshape(H, 1)      # (H, 1) column bias
    w2_row = jnp.asarray(w2, jnp.float32).reshape(1, H)      # (1, H) output row
    b2_2d = jnp.asarray(b2, jnp.float32).reshape(1, 1)       # scalar -> SMEM

    # Batch tile selection:
    #  * B <= 128: single grid step, block == (padded) full array dims.
    #  * B  > 128: lane-dense TB (multiple of 128) and >= 2 grid steps so the
    #    "parallel" batch axis can shard across v7x's two TensorCores.
    if B <= 128:
        TB = _round_up(max(B, 1), 16 if use_bf16_inputs else 8)
    else:
        TB = min(block_b, _round_up(-(-B // 2), 128))
    B_pad = _round_up(B, TB)
    if B_pad != B:
        x = jnp.pad(x, ((0, B_pad - B), (0, 0)))
    grid = (B_pad // TB,)

    cost = pl.CostEstimate(
        flops=2 * B_pad * H * D + 2 * B_pad * H + 3 * B_pad * H,
        transcendentals=2 * B_pad,                      # sigmoid ~ exp + reciprocal
        bytes_accessed=(x.dtype.itemsize * B_pad * D
                        + w1.dtype.itemsize * H * D
                        + 4 * (H + H + 1)
                        + 4 * B_pad),
    )

    # TODO(synk): if H*D is ever scaled up, add a D-reduction ("arbitrary") grid
    # axis / single-buffer the resident weights instead of keeping (H, D) fully
    # VMEM-resident (matters for v7x's 64 MiB VMEM).
    out = pl.pallas_call(
        ann_kernel,
        out_shape=jax.ShapeDtypeStruct((1, B_pad), jnp.float32),   # lane-dense output
        grid=grid,
        in_specs=[
            pl.BlockSpec((TB, D), lambda i: (i, 0)),               # x: tiled over batch
            pl.BlockSpec((H, D), lambda i: (0, 0)),                # w1: resident
            pl.BlockSpec((H, 1), lambda i: (0, 0)),                # b1 column: resident
            pl.BlockSpec((1, H), lambda i: (0, 0)),                # w2 row: resident
            pl.BlockSpec(memory_space=pltpu.MemorySpace.SMEM),     # b2: scalar in SMEM
        ],
        out_specs=pl.BlockSpec((1, TB), lambda i: (0, i)),
        compiler_params=pltpu.CompilerParams(
            dimension_semantics=("parallel",),
        ),
        cost_estimate=cost,
    )(x, w1, b1_col, w2_row, b2_2d)

    # (1, B_pad) -> (B, 1): same element order, so this is a trivial reshape.
    return out.reshape(B_pad, 1)[:B]


if __name__ == "__main__":
    # Small shapes consistent with the module: input_size=16, hidden_size=32, batch=8
    batch, input_size, hidden_size = 8, 16, 32
    key = jax.random.PRNGKey(0)
    kx, kw1, kb1, kw2, kb2 = jax.random.split(key, 5)

    x = jax.random.normal(kx, (batch, input_size), dtype=jnp.float32)
    bound1 = 1.0 / (input_size ** 0.5)
    w1 = jax.random.uniform(kw1, (hidden_size, input_size), jnp.float32, -bound1, bound1)
    b1 = jax.random.uniform(kb1, (hidden_size,), jnp.float32, -bound1, bound1)
    bound2 = 1.0 / (hidden_size ** 0.5)
    w2 = jax.random.uniform(kw2, (1, hidden_size), jnp.float32, -bound2, bound2)
    b2 = jax.random.uniform(kb2, (1,), jnp.float32, -bound2, bound2)

    def reference(xr):
        return jax.nn.sigmoid(jnp.maximum(xr @ w1.T + b1, 0.0) @ w2.T + b2)

    # 1) f32, single-tile path (exact match vs reference).
    out = ann_forward(x, w1, b1, w2, b2)
    jax.block_until_ready(out)
    ref = reference(x)
    assert out.shape == (batch, 1)
    assert jnp.allclose(out, ref, atol=1e-5), "f32 mismatch vs reference"

    # 2) multi-tile grid (>=2 steps) with bf16-streamed inputs (v6e/v7x path).
    B2 = 384
    x2 = jax.random.normal(jax.random.PRNGKey(1), (B2, input_size), dtype=jnp.float32)
    out2 = ann_forward(x2, w1, b1, w2, b2, use_bf16_inputs=True)
    jax.block_until_ready(out2)
    ref2 = reference(x2)
    assert out2.shape == (B2, 1)
    assert jnp.allclose(out2, ref2, atol=2e-2), "bf16 mismatch vs reference"

    print("KERNEL_OK")
</pallas_src>

<mosaic_0001>
module attributes {stable_mosaic.version = 11 : i64} {
  func.func @ann_kernel(%arg0: i32, %arg1: memref<8x16xf32, #tpu.memory_space<vmem>>, %arg2: memref<32x16xf32, #tpu.memory_space<vmem>>, %arg3: memref<32x1xf32, #tpu.memory_space<vmem>>, %arg4: memref<1x32xf32, #tpu.memory_space<vmem>>, %arg5: memref<1x1xf32, #tpu.memory_space<smem>>, %arg6: memref<1x8xf32, #tpu.memory_space<vmem>>) attributes {dimension_semantics = [#tpu.dimension_semantics<parallel>], iteration_bounds = array<i64: 1>, scalar_prefetch = 0 : i64, scratch_operands = 0 : i64, tpu.core_type = #tpu.core_type<tc>, window_params = [{transform_indices = @transform_0, window_bounds = array<i64: 8, 16>}, {pipeline_mode = #tpu.pipeline_mode<synchronous>, transform_indices = @transform_1, window_bounds = array<i64: 32, 16>}, {pipeline_mode = #tpu.pipeline_mode<synchronous>, transform_indices = @transform_2, window_bounds = array<i64: 32, 1>}, {pipeline_mode = #tpu.pipeline_mode<synchronous>, transform_indices = @transform_3, window_bounds = array<i64: 1, 32>}, {transform_indices = @transform_4, window_bounds = array<i64: 1, 1>}, {transform_indices = @transform_5, window_bounds = array<i64: 1, 8>}]} {
    %c0 = arith.constant 0 : index
    %c0_0 = arith.constant 0 : index
    %0 = vector.load %arg2[%c0, %c0_0] : memref<32x16xf32, #tpu.memory_space<vmem>>, vector<32x16xf32>
    %c0_1 = arith.constant 0 : index
    %c0_2 = arith.constant 0 : index
    %1 = vector.load %arg1[%c0_1, %c0_2] : memref<8x16xf32, #tpu.memory_space<vmem>>, vector<8x16xf32>
    %cst = arith.constant dense<0.000000e+00> : vector<32x8xf32>
    %2 = tpu.matmul %0, %1, %cst {dimension_numbers = #tpu.dot_dimension_numbers<[1], [1], [0], [0], [0, 0, 1, 0], [], []>} : vector<32x16xf32>, vector<8x16xf32>, vector<32x8xf32> -> vector<32x8xf32>
    %c0_3 = arith.constant 0 : index
    %c0_4 = arith.constant 0 : index
    %3 = vector.load %arg3[%c0_3, %c0_4] : memref<32x1xf32, #tpu.memory_space<vmem>>, vector<32x1xf32>
    %4 = vector.broadcast %3 : vector<32x1xf32> to vector<32x8xf32>
    %5 = arith.addf %2, %4 : vector<32x8xf32>
    %cst_5 = arith.constant 0.000000e+00 : f32
    %6 = vector.broadcast %cst_5 : f32 to vector<32x8xf32>
    %7 = arith.maximumf %5, %6 : vector<32x8xf32>
    %c0_6 = arith.constant 0 : index
    %c0_7 = arith.constant 0 : index
    %8 = vector.load %arg4[%c0_6, %c0_7] : memref<1x32xf32, #tpu.memory_space<vmem>>, vector<1x32xf32>
    %cst_8 = arith.constant dense<0.000000e+00> : vector<1x8xf32>
    %9 = tpu.matmul %8, %7, %cst_8 {dimension_numbers = #tpu.dot_dimension_numbers<[1], [0], [0], [1], [0, 0, 1, 1], [], []>} : vector<1x32xf32>, vector<32x8xf32>, vector<1x8xf32> -> vector<1x8xf32>
    %c0_9 = arith.constant 0 : index
    %c0_10 = arith.constant 0 : index
    %10 = memref.load %arg5[%c0_9, %c0_10] : memref<1x1xf32, #tpu.memory_space<smem>>
    %11 = vector.broadcast %10 : f32 to vector<1x8xf32>
    %12 = arith.addf %9, %11 : vector<1x8xf32>
    %13 = arith.negf %12 : vector<1x8xf32>
    %14 = math.exp %13 : vector<1x8xf32>
    %cst_11 = arith.constant 1.000000e+00 : f32
    %15 = vector.broadcast %cst_11 : f32 to vector<1x8xf32>
    %16 = arith.addf %15, %14 : vector<1x8xf32>
    %17 = arith.divf %15, %16 : vector<1x8xf32>
    %c0_12 = arith.constant 0 : index
    %c0_13 = arith.constant 0 : index
    %18 = vector.load %arg6[%c0_12, %c0_13] : memref<1x8xf32, #tpu.memory_space<vmem>>, vector<1x8xf32>
    tpu.vector_store %arg6[%c0_12, %c0_13], %17 {strides = array<i32>} : memref<1x8xf32, #tpu.memory_space<vmem>>, vector<1x8xf32>,
    return
  }
  func.func @transform_0(%arg0: i32) -> (i32, i32) {
    %c0_i32 = arith.constant 0 : i32
    %c0_i32_0 = arith.constant 0 : i32
    return %arg0, %c0_i32 : i32, i32
  }
  func.func @transform_1(%arg0: i32) -> (i32, i32) {
    %c0_i32 = arith.constant 0 : i32
    %c0_i32_0 = arith.constant 0 : i32
    %c0_i32_1 = arith.constant 0 : i32
    return %c0_i32, %c0_i32_0 : i32, i32
  }
  func.func @transform_2(%arg0: i32) -> (i32, i32) {
    %c0_i32 = arith.constant 0 : i32
    %c0_i32_0 = arith.constant 0 : i32
    %c0_i32_1 = arith.constant 0 : i32
    return %c0_i32, %c0_i32_0 : i32, i32
  }
  func.func @transform_3(%arg0: i32) -> (i32, i32) {
    %c0_i32 = arith.constant 0 : i32
    %c0_i32_0 = arith.constant 0 : i32
    %c0_i32_1 = arith.constant 0 : i32
    return %c0_i32, %c0_i32_0 : i32, i32
  }
  func.func @transform_4(%arg0: i32) -> (i32, i32) {
    %c0_i32 = arith.constant 0 : i32
    %c0_i32_0 = arith.constant 0 : i32
    %c0_i32_1 = arith.constant 0 : i32
    return %c0_i32, %c0_i32_0 : i32, i32
  }
  func.func @transform_5(%arg0: i32) -> (i32, i32) {
    %c0_i32 = arith.constant 0 : i32
    %c0_i32_0 = arith.constant 0 : i32
    return %c0_i32, %arg0 : i32, i32
  }
}

</mosaic_0001>

<bundles_post_ra>
// kernel: tpu_custom_call.1
= control target key start
LH: loop header
LB: loop body
LE: loop exit
PB: predicated region body
PF: predicated region fallthrough
CT: control target
= control target key end

     0   :  { %vm51_vm0 = vcmask 130048   ;;  %v207_v4 = vmov 0   ;;  %s282_s0 = inlined_call_operand.vmem [shape: f32[8,16], index: 0, kind: input, shape index: {}]   ;;  %s283_s1 = inlined_call_operand.vmem [shape: f32[32,16], index: 1, kind: input, shape index: {}]   ;;  %s284_s2 = inlined_call_operand.vmem [shape: f32[32,1], index: 2, kind: input, shape index: {}]   ;;  %s285_s3 = inlined_call_operand.vmem [shape: f32[1,32], index: 3, kind: input, shape index: {}]   ;;  %s286_s4 = inlined_call_operand.<no memory space> [shape: f32[1,1], index: 4, kind: input, shape index: {}]   ;;  %s287_s5 = inlined_call_operand.hbm [shape: f32[1,8], index: 5, kind: output, shape index: {}]  }
   0x1   :  { %v26_v0 = vld [vmem:[%s282_s0] sm:$0xff]  ;;  %v23_v1 = vld [vmem:[%s283_s1 + $0x8] sm:$0xff]  ;;  %v25_v2 = vld [vmem:[%s283_s1 + $0x18] sm:$0xff]  ;;  %175 = vset.pattern.permute.xlu0 %v207_v4  ;;  %176 = vset.pattern.permute.xlu1 %v207_v4 }
   0x2   :  { %171 = vmatpush.xpose.msk.msra.mxu2 %vm51_vm0, %v26_v0  ;;  %172 = vmatpush.xpose.msk.msra.mxu3 %vm51_vm0, %v26_v0  ;;  %v30_v3 = vld [vmem:[%s284_s2 + $0x18] sm:$0xff]  ;;  %v22_v5 = vld [vmem:[%s283_s1] sm:$0xff]  ;;  %v28_v6 = vld [vmem:[%s284_s2 + $0x8] sm:$0xff] }
   0x3   :  { %164 = vmatpush.xpose.msk.msra.mxu0 %vm51_vm0, %v26_v0  ;;  %48 = vperm.xlu0 %175, %v30_v3  }
   0x4   :  { %11 = vsyncpa [#allocation4], 0  ;;  %38 = vperm.xlu1 %176, %v28_v6   ;;  %v29_v7 = vld [vmem:[%s284_s2 + $0x10] sm:$0xff]  ;;  %v27_v9 = vld [vmem:[%s284_s2] sm:$0xff]  ;;  %vm103_vm1 = vcmask 261120   ;;  %v102_v27 = vstv %s286_s4  ;;  %s155_s4 = sshll.u32 %s287_s5, 4  ;;  %s156_s4 = int_to_ptr.hbm [resolvable:$true] %s155_s4 }
   0x5   :  { %166 = vmatmul.msk.f32.vlgmr.msra.gmra.mxu2 %vm51_vm0, %v23_v1  ;;  %168 = vmatmul.msk.f32.vlgmr.msra.gmra.mxu3 %vm51_vm0, %v25_v2  ;;  %v24_v8 = vld [vmem:[%s283_s1 + $0x10] sm:$0xff]  ;;  %v100_v26 = vld [vmem:[%s285_s3] sm:$0x1]  ;;  %s208_s3 = smov [#allocation3]   ;;  %vm146_vm5 = vcmask 57344  }
   0x6   :  { %165 = vmatmul.msk.f32.vlgmr.msra.gmra.mxu0 %vm51_vm0, %v22_v5  ;;  %s153_s12 = sshll.u32 %s208_s3, 4  ;;  %s154_s12 = int_to_ptr.vmem [resolvable:$true] %s153_s12 }
   0xb   :  { %43 = vperm.xlu0 %175, %v29_v7  }
   0xc   :  { %33 = vperm.xlu1 %176, %v27_v9  }
   0xd   :  { %167 = vmatmul.msk.f32.gmra.mxu2 %vm51_vm0, %v24_v8 }
  0x75   :  { %v49_v10 = vpop.permute.xlu0 %48 }
  0x76   :  { %v39_v11 = vpop.permute.xlu1 %38 }
  0x7d   :  { %v44_v16 = vpop.permute.xlu0 %43 }
  0x7e   :  { %v34_v17 = vpop.permute.xlu1 %33 }
  0x83   :  { %v84_v18 = vpop.f32.mrf.mxu0 }
  0x84   :  { %v85_v22 = vadd.f32 %v84_v18, %v34_v17 }
  0x86   :  { %v96_v25 = vmax.f32 %v85_v22, 0.0 }
  0x88   :  { %v87_v12 = vpop.f32.mrf.mxu2  ;;  %v93_v13 = vpop.f32.mrf.mxu3 }
  0x89   :  { %v94_v14 = vadd.f32 %v93_v13, %v49_v10  ;;  %v88_v20 = vadd.f32 %v87_v12, %v39_v11 }
  0x8b   :  { %v99_v15 = vmax.f32 %v94_v14, 0.0  ;;  %v97_v24 = vmax.f32 %v88_v20, 0.0 }
  0x8d   :  { %119 = vmatpush.msra.mxu1 %v99_v15 }
  0x90   :  { %v90_v19 = vpop.f32.mrf.mxu2 }
  0x91   :  { %v91_v21 = vadd.f32 %v90_v19, %v44_v16 }
  0x93   :  { %v98_v23 = vmax.f32 %v91_v21, 0.0 }
  0x95   :  { %120 = vmatpush.msra.mxu1 %v98_v23 }
  0x97   :  { %121 = vmatpush.msra.mxu1 %v97_v24 }
  0x99   :  { %122 = vmatpush.msra.mxu1 %v96_v25 }
  0x9a   :  { %169 = vmatmul.msk.f32.vlgmr.msra.gmra.mxu1 %vm103_vm1, %v100_v26 }
 0x117   :  { %v124_v28 = vpop.f32.mrf.mxu1 }
 0x118   :  { %v125_v29 = vadd.f32 %v124_v28, %v102_v27 }
 0x11a   :  { %v170_v30 = vmul.f32 -1.442695, %v125_v29 }
 0x11c   :  { %177 = vpow2.f32 %v170_v30 }
 0x122   :  { %v178_v31 = vpop.eup %177 }
 0x123   :  { %v130_v32 = vadd.f32 1.0, %v178_v31 }
 0x125   :  { %179 = vrcp.f32 %v130_v32  ;;  %v142_v36 = vand.u32 2147483648, %v130_v32  ;;  %v140_v38 = vand.u32 2147483647, %v130_v32  ;;  %vm136_vm3 = vweird.f32 %v130_v32 }
 0x127   :  { %v143_v40 = vor.u32 1.1754944e-38, %v142_v36  ;;  %vm141_vm6 = vcmp.eq.f32.partialorder %v140_v38, 8.507059e+37 }
 0x12b   :  { %v180_v33 = vpop.eup %179 }
 0x12c   :  { %v132_v34 = vmul.f32 %v180_v33, %v130_v32  ;;  %vm137_vm2 = vweird.f32 %v180_v33 }
 0x12d   :  { %vm138_vm4 = vmor %vm136_vm3, %vm137_vm2 }
 0x12e   :  { %v133_v35 = vsub.f32 1.0, %v132_v34 }
 0x130   :  { %v134_v37 = vmul.f32 %v180_v33, %v133_v35 }
 0x132   :  { %v135_v39 = vadd.f32 %v180_v33, %v134_v37 }
 0x134   :  { %v139_v41 = vsel %vm138_vm4, %v180_v33, %v135_v39 }
 0x135   :  { %v144_v42 = vsel %vm141_vm6, %v143_v40, %v139_v41 }
 0x136   :  { %147 = vst.msk [vmem:[#allocation3] sm:$0x1] %vm146_vm5, %v144_v42 }
 0x137   :  { %158 = dma.vmem_to_hbm [thread:$0]  %s154_s12, 16, %s156_s4, [#allocation4]  }
 0x138   :  { %205 = dma.done.wait [#allocation4], 16  }
 0x139   :  { %206 = vsyncadd [#allocation4], 4294967280 }
 0x13a   :  { %163 = vsyncpa [#allocation4], 1 }

</bundles_post_ra>
